<compile_context>
chip_gen: v7x
topology: tpu7x:2x2x1
jax: 0.10.0
libtpu: 0.0.40
codegen_flags: <defaults>
</compile_context>

<pallas_src>
import math

import jax
import jax.numpy as jnp
from jax.experimental import pallas as pl
from jax.experimental.pallas import tpu as pltpu


def _round_up(x, m):
    return (x + m - 1) // m * m


def _cdiv(a, b):
    return (a + b - 1) // b


def _vmem_cap_bytes():
    """Per-generation scoped-VMEM cap (v5e/v6e: 128 MiB phys -> 64 MiB; v7x: 64 -> 32)."""
    cap = 128 << 20
    try:
        info = pltpu.get_tpu_info()
        cap = int(getattr(info, "vmem_capacity_bytes", cap))
    except Exception:
        pass
    return max(16 << 20, min(cap // 2, 64 << 20))


# --------------------------------------------------------------------------------------
# Kernels
# --------------------------------------------------------------------------------------
def _snakebeta_kernel_direct(x_ref, w_ref, p_ref, o_ref):
    """Resident-weight path: single K/N block per M tile, no accumulator.

    x_ref:(tm,K) caller dtype; w_ref:(K,N) matmul dtype; p_ref:(8,N) f32
    rows = [bias, exp(alpha), 1/(exp(beta)+eps)]; o_ref:(tm,N) caller dtype.
    """
    w = w_ref[...]
    x = x_ref[...]
    if x.dtype != w.dtype:          # in-kernel cast (VPU, hidden under MXU)
        x = x.astype(w.dtype)
    y = jnp.dot(x, w, preferred_element_type=jnp.float32)
    bias = p_ref[0:1, :]
    alpha = p_ref[1:2, :]           # exp(alpha), precomputed
    inv_beta = p_ref[2:3, :]        # 1/(exp(beta)+eps), precomputed
    y = y + bias
    s = jnp.sin(y * alpha)
    o_ref[...] = (y + inv_beta * (s * s)).astype(o_ref.dtype)


def _snakebeta_kernel_acc(x_ref, w_ref, p_ref, o_ref, acc_ref):
    """Tiled fallback path: 3-D grid (M, N, K) with K reduction last, f32 accumulator."""
    k = pl.program_id(2)

    @pl.when(k == 0)
    def _():
        acc_ref[...] = jnp.zeros_like(acc_ref)

    w = w_ref[...]
    x = x_ref[...]
    if x.dtype != w.dtype:
        x = x.astype(w.dtype)
    acc_ref[...] += jnp.dot(x, w, preferred_element_type=jnp.float32)

    @pl.when(k == pl.num_programs(2) - 1)
    def _():
        bias = p_ref[0:1, :]
        alpha = p_ref[1:2, :]
        inv_beta = p_ref[2:3, :]
        y = acc_ref[...] + bias
        s = jnp.sin(y * alpha)
        o_ref[...] = (y + inv_beta * (s * s)).astype(o_ref.dtype)


# --------------------------------------------------------------------------------------
# Parameter prep (one-time)
# --------------------------------------------------------------------------------------
def prepare_snakebeta_params(weight, bias, alpha, beta, *,
                             alpha_logscale=True,
                             matmul_dtype=jnp.bfloat16,
                             eps=1e-9):
    """Transpose weight once, hoist exp()/reciprocal once, stack vectors into (8, N).

    weight: (N, K) as in nn.Linear; returns (w_t:(K,N) in matmul_dtype, params:(8,N) f32).
    """
    w_t = jnp.asarray(weight).T.astype(matmul_dtype)            # (K, N), done once
    a = jnp.exp(alpha) if alpha_logscale else jnp.asarray(alpha)
    b = jnp.exp(beta) if alpha_logscale else jnp.asarray(beta)
    inv_beta = 1.0 / (b.astype(jnp.float32) + eps)
    n = w_t.shape[1]
    params = jnp.zeros((8, n), jnp.float32)                     # 8 rows: sublane aligned
    params = params.at[0].set(jnp.asarray(bias, jnp.float32))
    params = params.at[1].set(a.astype(jnp.float32))
    params = params.at[2].set(inv_beta)
    return w_t, params


# --------------------------------------------------------------------------------------
# Forward
# --------------------------------------------------------------------------------------
def snakebeta_forward(x, w_t, params, *, tm=512, tn=256, tk=2048, force_tiled=False):
    """x: (..., K) any float dtype; w_t: (K, N) pre-transposed; params: (8, N) f32.

    Output has the same dtype as x.
    """
    out_dtype = x.dtype
    lead = x.shape[:-1]
    K = x.shape[-1]
    Kw, N = w_t.shape
    assert Kw == K, f"weight K ({Kw}) != input K ({K})"
    M = math.prod(lead) if lead else 1

    x2 = x.reshape(M, K)                        # no dtype cast, no padding in HBM
    x_isz = jnp.dtype(x2.dtype).itemsize
    w_isz = jnp.dtype(w_t.dtype).itemsize
    o_isz = jnp.dtype(out_dtype).itemsize

    cap = _vmem_cap_bytes()
    cap_use = cap - (4 << 20)                   # headroom for Mosaic internal scratch

    # ---------------- Path A: weight VMEM-resident, no accumulator -------------------
    def budget_a(tm_):
        return (2 * tm_ * K * x_isz             # x tiles (double-buffered, caller dtype)
                + 2 * K * N * w_isz             # weight (index constant -> fetched once)
                + 2 * 8 * N * 4                 # params slab
                + 2 * tm_ * N * o_isz)          # out tiles (double-buffered)

    tm_a = _round_up(min(tm, _round_up(M, 8)), 8)
    while budget_a(tm_a) > cap_use and tm_a > 8:
        tm_a = max(8, _round_up(tm_a // 2, 8))

    if not force_tiled and budget_a(tm_a) <= cap_use:
        # Keep >= 2 M-tiles so both v7x TensorCores get work (cheap on 1-TC parts).
        if _cdiv(M, tm_a) == 1 and M >= 256:
            tm_a = _round_up(_cdiv(M, 2), 8)
        mt = _cdiv(M, tm_a)

        cost = pl.CostEstimate(
            flops=2 * M * N * K + 4 * M * N,
            transcendentals=M * N,
            bytes_accessed=(M * K * x_isz + K * N * w_isz + 8 * N * 4 + M * N * o_isz),
        )
        vmem_limit = int(min(cap, max(budget_a(tm_a) + (4 << 20), 8 << 20)))

        out2 = pl.pallas_call(
            _snakebeta_kernel_direct,
            out_shape=jax.ShapeDtypeStruct((M, N), out_dtype),
            grid_spec=pltpu.PrefetchScalarGridSpec(
                num_scalar_prefetch=0,
                grid=(mt,),
                in_specs=[
                    pl.BlockSpec((tm_a, K), lambda i: (i, 0)),   # x: streamed once
                    pl.BlockSpec((K, N), lambda i: (0, 0)),      # weight: resident
                    pl.BlockSpec((8, N), lambda i: (0, 0)),      # bias/exp(alpha)/inv_beta
                ],
                out_specs=pl.BlockSpec((tm_a, N), lambda i: (i, 0)),
            ),
            compiler_params=pltpu.CompilerParams(
                dimension_semantics=("parallel",),
                vmem_limit_bytes=vmem_limit,
            ),
            cost_estimate=cost,
        )(x2, w_t, params)
        return out2.reshape(*lead, N)

    # ---------------- Path B: 3-D tiled grid (very large weights) --------------------
    Kp128 = _round_up(K, 128)
    Np128 = _round_up(N, 128)

    # K tiles: big (>=512 preferred), minimal padding.
    kt = max(1, _cdiv(Kp128, min(tk, Kp128)))
    tk_b = _round_up(_cdiv(Kp128, kt), 128)
    Kp = tk_b * kt

    # N tiles: prefer tn, fall back to 128 to avoid padding waste (e.g. N=320).
    tn_b = min(tn, Np128)
    if Np128 % tn_b != 0:
        tn_b = 128
    Np = Np128
    nt = Np // tn_b

    def budget_b(tm_):
        return (2 * (tm_ * tk_b * x_isz + tk_b * tn_b * w_isz
                     + 8 * tn_b * 4 + tm_ * tn_b * o_isz)
                + tm_ * tn_b * 4)               # f32 accumulator

    tm_b = _round_up(min(tm, _round_up(M, 8)), 8)
    while budget_b(tm_b) > cap_use and tm_b > 8:
        tm_b = max(8, _round_up(tm_b // 2, 8))
    mt = _cdiv(M, tm_b)

    # K padding contributes zeros to the dot; padded N columns are sliced off.
    x_b = x2 if Kp == K else jnp.pad(x2, ((0, 0), (0, Kp - K)))
    w_b = w_t if (Kp, Np) == (K, N) else jnp.pad(w_t, ((0, Kp - K), (0, Np - N)))
    p_b = params if Np == N else jnp.pad(params, ((0, 0), (0, Np - N)))

    cost = pl.CostEstimate(
        flops=2 * M * Np * Kp + 4 * M * Np,
        transcendentals=M * Np,
        bytes_accessed=(M * Kp * x_isz * nt + Kp * Np * w_isz * mt
                        + 8 * Np * 4 * mt + M * Np * o_isz),
    )
    vmem_limit = int(min(cap, max(budget_b(tm_b) + (4 << 20), 8 << 20)))

    out2 = pl.pallas_call(
        _snakebeta_kernel_acc,
        out_shape=jax.ShapeDtypeStruct((M, Np), out_dtype),
        grid_spec=pltpu.PrefetchScalarGridSpec(
            num_scalar_prefetch=0,
            grid=(mt, nt, kt),                                          # reduction last
            in_specs=[
                pl.BlockSpec((tm_b, tk_b), lambda i, j, k: (i, k)),     # x tile
                pl.BlockSpec((tk_b, tn_b), lambda i, j, k: (k, j)),     # weight tile
                pl.BlockSpec((8, tn_b), lambda i, j, k: (0, j)),        # params tile
            ],
            out_specs=pl.BlockSpec((tm_b, tn_b), lambda i, j, k: (i, j)),
            scratch_shapes=[pltpu.VMEM((tm_b, tn_b), jnp.float32)],
        ),
        compiler_params=pltpu.CompilerParams(
            dimension_semantics=("parallel", "parallel", "arbitrary"),
            vmem_limit_bytes=vmem_limit,
        ),
        cost_estimate=cost,
    )(x_b, w_b, p_b)

    out = out2 if Np == N else out2[:, :N]
    return out.reshape(*lead, N)


# --------------------------------------------------------------------------------------
# Reference + tests
# --------------------------------------------------------------------------------------
def snakebeta_ref(x, weight, bias, alpha, beta, eps=1e-9):
    y = jnp.einsum("...k,nk->...n", x, weight) + bias
    a = jnp.exp(alpha)
    b = jnp.exp(beta)
    return y + 1.0 / (b + eps) * jnp.sin(y * a) ** 2


if __name__ == "__main__":
    key = jax.random.PRNGKey(0)
    k1, k2, k3, k4, k5 = jax.random.split(key, 5)

    # --- Small shape: f32 path (resident-weight kernel) -----------------------------
    batch, seq = 2, 8
    in_features, out_features = 32, 32

    x = jax.random.normal(k1, (batch, seq, in_features), dtype=jnp.float32)
    weight = jax.random.normal(k2, (out_features, in_features), dtype=jnp.float32) * 0.1
    bias = jax.random.normal(k3, (out_features,), dtype=jnp.float32) * 0.1
    alpha = jax.random.normal(k4, (out_features,), dtype=jnp.float32) * 0.1
    beta = jax.random.normal(k5, (out_features,), dtype=jnp.float32) * 0.1

    ref = snakebeta_ref(x, weight, bias, alpha, beta)

    w_t_f32, p_f32 = prepare_snakebeta_params(weight, bias, alpha, beta,
                                              matmul_dtype=jnp.float32)
    out_f32 = snakebeta_forward(x, w_t_f32, p_f32)
    jax.block_until_ready(out_f32)
    assert out_f32.shape == (batch, seq, out_features)
    assert out_f32.dtype == x.dtype
    assert jnp.allclose(out_f32, ref, atol=1e-2, rtol=1e-2), "f32 path mismatch"

    # Default fast path: bf16 weight, in-kernel cast of f32 x, f32 accumulation.
    w_t_bf, p_bf = prepare_snakebeta_params(weight, bias, alpha, beta)
    out_bf = snakebeta_forward(x, w_t_bf, p_bf)
    jax.block_until_ready(out_bf)
    assert jnp.allclose(out_bf, ref, atol=3e-2, rtol=3e-2), "bf16 path mismatch"

    # bf16 activations in -> bf16 out straight from the kernel (no f32 writeback).
    out_bf_in = snakebeta_forward(x.astype(jnp.bfloat16), w_t_bf, p_bf)
    jax.block_until_ready(out_bf_in)
    assert out_bf_in.dtype == jnp.bfloat16
    assert jnp.allclose(out_bf_in.astype(jnp.float32), ref, atol=1e-1, rtol=1e-1), \
        "bf16-in/bf16-out path mismatch"

    # --- Larger, non-tile-aligned shape: partial M tile, awkward N ------------------
    kb = jax.random.split(jax.random.PRNGKey(1), 5)
    B2, S2, K2, N2 = 2, 200, 384, 320
    x2 = jax.random.normal(kb[0], (B2, S2, K2), dtype=jnp.float32)
    w2 = jax.random.normal(kb[1], (N2, K2), dtype=jnp.float32) * 0.05
    b2 = jax.random.normal(kb[2], (N2,), dtype=jnp.float32) * 0.1
    a2 = jax.random.normal(kb[3], (N2,), dtype=jnp.float32) * 0.1
    be2 = jax.random.normal(kb[4], (N2,), dtype=jnp.float32) * 0.1

    ref2 = snakebeta_ref(x2, w2, b2, a2, be2)
    w2_t, p2 = prepare_snakebeta_params(w2, b2, a2, be2)

    # Resident-weight path (the default) on a non-aligned shape.
    out2 = snakebeta_forward(x2, w2_t, p2)
    jax.block_until_ready(out2)
    assert out2.shape == (B2, S2, N2)
    assert jnp.allclose(out2, ref2, atol=8e-2, rtol=8e-2), "resident-weight path mismatch"

    # Force the tiled/accumulator fallback path to exercise K/N padding + partial M tile.
    out3 = snakebeta_forward(x2, w2_t, p2, tm=128, tn=128, tk=256, force_tiled=True)
    jax.block_until_ready(out3)
    assert out3.shape == (B2, S2, N2)
    assert jnp.allclose(out3, ref2, atol=8e-2, rtol=8e-2), "tiled fallback path mismatch"

    print("KERNEL_OK")
</pallas_src>

<mosaic_0001>
module attributes {stable_mosaic.version = 11 : i64} {
  func.func @_snakebeta_kernel_direct(%arg0: i32, %arg1: memref<16x32xf32, #tpu.memory_space<vmem>>, %arg2: memref<32x32xf32, #tpu.memory_space<vmem>>, %arg3: memref<8x32xf32, #tpu.memory_space<vmem>>, %arg4: memref<16x32xf32, #tpu.memory_space<vmem>>) attributes {dimension_semantics = [#tpu.dimension_semantics<parallel>], iteration_bounds = array<i64: 1>, scalar_prefetch = 0 : i64, scratch_operands = 0 : i64, tpu.core_type = #tpu.core_type<tc>, window_params = [{transform_indices = @transform_0, window_bounds = array<i64: 16, 32>}, {pipeline_mode = #tpu.pipeline_mode<synchronous>, transform_indices = @transform_1, window_bounds = array<i64: 32, 32>}, {pipeline_mode = #tpu.pipeline_mode<synchronous>, transform_indices = @transform_2, window_bounds = array<i64: 8, 32>}, {transform_indices = @transform_3, window_bounds = array<i64: 16, 32>}]} {
    %c0 = arith.constant 0 : index
    %c0_0 = arith.constant 0 : index
    %0 = vector.load %arg2[%c0, %c0_0] : memref<32x32xf32, #tpu.memory_space<vmem>>, vector<32x32xf32>
    %c0_1 = arith.constant 0 : index
    %c0_2 = arith.constant 0 : index
    %1 = vector.load %arg1[%c0_1, %c0_2] : memref<16x32xf32, #tpu.memory_space<vmem>>, vector<16x32xf32>
    %cst = arith.constant dense<0.000000e+00> : vector<16x32xf32>
    %2 = tpu.matmul %1, %0, %cst {dimension_numbers = #tpu.dot_dimension_numbers<[1], [0], [0], [1], [0, 0, 1, 1], [], []>} : vector<16x32xf32>, vector<32x32xf32>, vector<16x32xf32> -> vector<16x32xf32>
    %c0_3 = arith.constant 0 : index
    %c0_4 = arith.constant 0 : index
    %3 = vector.load %arg3[%c0_3, %c0_4] : memref<8x32xf32, #tpu.memory_space<vmem>>, vector<1x32xf32>
    %c1 = arith.constant 1 : index
    %c0_5 = arith.constant 0 : index
    %4 = vector.load %arg3[%c1, %c0_5] : memref<8x32xf32, #tpu.memory_space<vmem>>, vector<1x32xf32>
    %c2 = arith.constant 2 : index
    %c0_6 = arith.constant 0 : index
    %5 = vector.load %arg3[%c2, %c0_6] : memref<8x32xf32, #tpu.memory_space<vmem>>, vector<1x32xf32>
    %6 = vector.broadcast %3 : vector<1x32xf32> to vector<16x32xf32>
    %7 = arith.addf %2, %6 : vector<16x32xf32>
    %8 = vector.broadcast %4 : vector<1x32xf32> to vector<16x32xf32>
    %9 = arith.mulf %7, %8 : vector<16x32xf32>
    %10 = math.sin %9 : vector<16x32xf32>
    %11 = arith.mulf %10, %10 : vector<16x32xf32>
    %12 = vector.broadcast %5 : vector<1x32xf32> to vector<16x32xf32>
    %13 = arith.mulf %12, %11 : vector<16x32xf32>
    %14 = arith.addf %7, %13 : vector<16x32xf32>
    %c0_7 = arith.constant 0 : index
    %c0_8 = arith.constant 0 : index
    %15 = vector.load %arg4[%c0_7, %c0_8] : memref<16x32xf32, #tpu.memory_space<vmem>>, vector<16x32xf32>
    tpu.vector_store %arg4[%c0_7, %c0_8], %14 {strides = array<i32>} : memref<16x32xf32, #tpu.memory_space<vmem>>, vector<16x32xf32>,
    return
  }
  func.func @transform_0(%arg0: i32) -> (i32, i32) {
    %c0_i32 = arith.constant 0 : i32
    %c0_i32_0 = arith.constant 0 : i32
    return %arg0, %c0_i32 : i32, i32
  }
  func.func @transform_1(%arg0: i32) -> (i32, i32) {
    %c0_i32 = arith.constant 0 : i32
    %c0_i32_0 = arith.constant 0 : i32
    %c0_i32_1 = arith.constant 0 : i32
    return %c0_i32, %c0_i32_0 : i32, i32
  }
  func.func @transform_2(%arg0: i32) -> (i32, i32) {
    %c0_i32 = arith.constant 0 : i32
    %c0_i32_0 = arith.constant 0 : i32
    %c0_i32_1 = arith.constant 0 : i32
    return %c0_i32, %c0_i32_0 : i32, i32
  }
  func.func @transform_3(%arg0: i32) -> (i32, i32) {
    %c0_i32 = arith.constant 0 : i32
    %c0_i32_0 = arith.constant 0 : i32
    return %arg0, %c0_i32 : i32, i32
  }
}

</mosaic_0001>

<bundles_post_ra>
// kernel: tpu_custom_call.1
= control target key start
LH: loop header
LB: loop body
LE: loop exit
PB: predicated region body
PF: predicated region fallthrough
CT: control target
= control target key end

     0   :  { %8 = vsyncpa [#allocation3], 0  ;;  %s723_s0 = inlined_call_operand.hbm [shape: f32[16,32], index: 0, kind: input, shape index: {}]   ;;  %s724_s1 = inlined_call_operand.hbm [shape: f32[32,32], index: 1, kind: input, shape index: {}]   ;;  %s725_s2 = inlined_call_operand.hbm [shape: f32[8,32], index: 2, kind: input, shape index: {}]   ;;  %s726_s3 = inlined_call_operand.hbm [shape: f32[16,32], index: 3, kind: output, shape index: {}]  }
   0x1   :  { %9 = vsyncpa [#allocation6], 0 }
   0x2   :  { %10 = vsyncpa [#allocation4], 0  ;;  %s553_s12 = smov [#allocation5]   ;;  %s554_s14 = smov [#allocation2]  }
   0x3   :  { %s28_s13 = sshll.u32 %s553_s12, 4  ;;  %s16_s15 = sshll.u32 %s554_s14, 4  ;;  %s29_s13 = int_to_ptr.vmem [resolvable:$true] %s28_s13  ;;  %s585_s15 = int_to_ptr.vmem [resolvable:$true] %s16_s15 }
   0x4   :  { %s459_s18 = scalar_lea.hbm %s724_s1, 512 }
   0x5   :  { %p460_p0 = scmp.ne.s32.totalorder %s724_s1, %s459_s18  ;;  %p463_p1 = scmp.lt.u32.totalorder %s459_s18, %s724_s1 }
   0x7   :  { %p465_p2 = pnand %p463_p1, %p460_p0 }
   0x9   :  { %468 = shalt.err (!%p465_p2)
}
   0xa   :  { %s469_s23 = scalar_lea.vmem %s29_s13, 512  ;;  %p474_p4 = scmp.lt.s32.totalorder %s29_s13, %s29_s13 }
   0xb   :  { %p470_p3 = scmp.ne.s32.totalorder %s29_s13, %s469_s23  ;;  %p475_p5 = scmp.lt.s32.totalorder %s469_s23, %s469_s23 }
   0xd   :  { %p476_p6 = por %p475_p5, %p474_p4 }
   0xf   :  { %p477_p7 = pnand %p476_p6, %p470_p3 }
  0x11   :  { %480 = shalt.err (!%p477_p7)
}
  0x12   :  { %s555_s24 = smov 128   ;;  %s556_s25 = smov 8  }
  0x13   :  { %34 = dma.hbm_to_vmem [thread:$0]  %s724_s1, 512, %s29_s13, [#allocation6], %s555_s24, %s555_s24, %s556_s25  }
  0x14   :  { %s481_s30 = scalar_lea.hbm %s723_s0, 256 }
  0x15   :  { %p482_p8 = scmp.ne.s32.totalorder %s723_s0, %s481_s30  ;;  %p485_p9 = scmp.lt.u32.totalorder %s481_s30, %s723_s0 }
  0x17   :  { %p487_p10 = pnand %p485_p9, %p482_p8 }
  0x19   :  { %490 = shalt.err (!%p487_p10)
}
  0x1a   :  { %s491_s8 = scalar_lea.vmem %s585_s15, 256  ;;  %p496_p12 = scmp.lt.s32.totalorder %s585_s15, %s585_s15 }
  0x1b   :  { %p492_p11 = scmp.ne.s32.totalorder %s585_s15, %s491_s8  ;;  %p497_p13 = scmp.lt.s32.totalorder %s491_s8, %s491_s8 }
  0x1d   :  { %p498_p0 = por %p497_p13, %p496_p12 }
  0x1f   :  { %p499_p1 = pnand %p498_p0, %p492_p11 }
  0x21   :  { %502 = shalt.err (!%p499_p1)
}
  0x22   :  { %22 = dma.hbm_to_vmem [thread:$0]  %s723_s0, 256, %s585_s15, [#allocation3], %s555_s24, %s555_s24, %s556_s25  }
  0x23   :  { %s557_s10 = smov [#allocation7]   ;;  %s503_s14 = scalar_lea.hbm %s725_s2, 128 }
  0x24   :  { %s41_s11 = sshll.u32 %s557_s10, 4  ;;  %p504_p2 = scmp.ne.s32.totalorder %s725_s2, %s503_s14  ;;  %s42_s11 = int_to_ptr.vmem [resolvable:$true] %s41_s11 }
  0x25   :  { %p507_p3 = scmp.lt.u32.totalorder %s503_s14, %s725_s2 }
  0x27   :  { %p509_p4 = pnand %p507_p3, %p504_p2 }
  0x29   :  { %512 = shalt.err (!%p509_p4)
}
  0x2a   :  { %s513_s20 = scalar_lea.vmem %s42_s11, 128  ;;  %p518_p6 = scmp.lt.s32.totalorder %s42_s11, %s42_s11 }
  0x2b   :  { %p514_p5 = scmp.ne.s32.totalorder %s42_s11, %s513_s20  ;;  %p519_p7 = scmp.lt.s32.totalorder %s513_s20, %s513_s20 }
  0x2d   :  { %p520_p8 = por %p519_p7, %p518_p6 }
  0x2f   :  { %p521_p9 = pnand %p520_p8, %p514_p5 }
  0x31   :  { %524 = shalt.err (!%p521_p9)
}
  0x32   :  { %44 = dma.hbm_to_vmem [thread:$0]  %s725_s2, 128, %s42_s11, [#allocation6]  }
  0x33   :  { %547 = dma.done.wait [#allocation3], 256  }
  0x34   :  { %548 = vsyncadd [#allocation3], 4294967040 }
  0x35   :  { %549 = dma.done.wait [#allocation6], 640  }
  0x36   :  { %550 = vsyncadd [#allocation6], 4294966656  ;;  %vm67_vm0 = vcmask 261120   ;;  %v54_v0 = vld [vmem:[#allocation5] sm:$0xff]  ;;  %v55_v1 = vld [vmem:[#allocation5 + $0x8] sm:$0xff]  ;;  %s564_s2 = smov [#allocation8]  }
  0x37   :  { %v56_v2 = vld [vmem:[#allocation5 + $0x10] sm:$0xff]  ;;  %v423_v3 = vpack.c.bf16 %v55_v1, %v54_v0  ;;  %v57_v4 = vld [vmem:[#allocation5 + $0x18] sm:$0xff]  ;;  %v393_v8 = vld [vmem:[#allocation7] ss:$0 sm:$0xff]  ;;  %v558_v36 = vmov 683565275  }
  0x38   :  { %v58_v5 = vld [vmem:[#allocation2] sm:$0xff]  ;;  %v427_v6 = vpack.c.bf16 %v57_v4, %v56_v2  ;;  %v59_v7 = vld [vmem:[#allocation2 + $0x8] sm:$0xff]  ;;  %v396_v9 = vld [vmem:[#allocation7 + $0x1] ss:$0 sm:$0xff]  ;;  %v559_v40 = vmov 2475754826  }
  0x39   :  { %420 = vmatprep.mubr.msk.f32.mxu0 %vm67_vm0, %v58_v5  ;;  %424 = vmatprep.subr.bf16.mxu0 %v423_v3  ;;  %v560_v42 = vmov 2131351028   ;;  %v561_v44 = vmov 2102212464   ;;  %v562_v46 = vmov 920167782  }
  0x3a   :  { %426 = vmatpush3.bf16.msra.mxu0 %v423_v3  ;;  %v563_v53 = vmov 1326507024   ;;  %s380_s21 = sshll.u32 %s564_s2, 4  ;;  %s381_s21 = int_to_ptr.vmem [resolvable:$true] %s380_s21 }
  0x3b   :  { %428 = vmatprep.subr.bf16.mxu0 %v427_v6  ;;  %s525_s22 = scalar_lea.vmem %s381_s21, 256  ;;  %p530_p11 = scmp.lt.s32.totalorder %s381_s21, %s381_s21 }
  0x3c   :  { %p526_p10 = scmp.ne.s32.totalorder %s381_s21, %s525_s22  ;;  %p531_p12 = scmp.lt.s32.totalorder %s525_s22, %s525_s22 }
  0x3e   :  { %430 = vmatpush3.bf16.msra.mxu0 %v427_v6  ;;  %p532_p13 = por %p531_p12, %p530_p11 }
  0x40   :  { %p533_p0 = pnand %p532_p13, %p526_p10 }
  0x41   :  { %421 = vmatmul.mubr.msk.f32.vlgmr.msra.gmra.mrb[0].mxu0 %vm67_vm0, %v59_v7 }
 0x114   :  { %v422_v10 = vpop.f32.mrb[0].mxu0 }
 0x115   :  { %v636_v11 = vadd.f32 %v422_v10, %v393_v8  ;;  %v140_v12 = vpop.f32.mrb[1].mxu0 }
 0x116   :  { %v638_v13 = vadd.f32 %v393_v8, %v140_v12 }
 0x117   :  { %v641_v14 = vmul.f32 %v396_v9, %v636_v11 }
 0x118   :  { %v644_v15 = vmul.f32 %v396_v9, %v638_v13 }
 0x119   :  { %v259_v16 = vand.u32 2147483647, %v641_v14  ;;  %v262_v17 = vand.u32 2139095040, %v641_v14  ;;  %vm261_vm15 = vcmp.lt.s32.totalorder %v641_v14, 0 }
 0x11a   :  { %v158_v18 = vand.u32 2139095040, %v644_v15  ;;  %v155_v21 = vand.u32 2147483647, %v644_v15 }
 0x11b   :  { %v263_v19 = vshrl.u32 %v262_v17, 23  ;;  %v266_v20 = vand.u32 8388607, %v259_v16 }
 0x11c   :  { %v159_v22 = vshrl.u32 %v158_v18, 23  ;;  %v654_v27 = vand.u32 8388607, %v155_v21 }
 0x11d   :  { %v401_v23 = vadd.s32 4294967169, %v263_v19  ;;  %v267_v26 = vor.u32 8388608, %v266_v20 }
 0x11e   :  { %v397_v24 = vadd.s32 4294967169, %v159_v22  ;;  %v163_v34 = vor.u32 8388608, %v654_v27 }
 0x11f   :  { %v269_v25 = vadd.s32 1, %v401_v23  ;;  %v656_v33 = vshll.u32 %v267_v26, 8 }
 0x120   :  { %v165_v28 = vadd.s32 1, %v397_v24 }
 0x121   :  { %vm270_vm1 = vcmp.gt.s32.totalorder %v269_v25, 0 }
 0x122   :  { %v271_v29 = vsel %vm270_vm1, %v269_v25, 0  ;;  %vm166_vm2 = vcmp.gt.s32.totalorder %v165_v28, 0  ;;  %vm260_vm1 = vcmp.le.f32.partialorder %v259_v16, 0.7853982 }
 0x123   :  { %v272_v30 = vshrl.u32 %v271_v29, 5  ;;  %v273_v31 = vand.u32 31, %v271_v29  ;;  %v167_v32 = vsel %vm166_vm2, %v165_v28, 0  ;;  %vm157_vm2 = vcmp.lt.s32.totalorder %v644_v15, 0 }
 0x124   :  { %v659_v38 = vshrl.u32 %v167_v32, 5  ;;  %v169_v39 = vand.u32 31, %v167_v32 }
 0x125   :  { %v274_v35 = vsub.s32 32, %v273_v31  ;;  %v276_v37 = vshll.u32 %v558_v36, %v273_v31  ;;  %v279_v41 = vshll.u32 %v559_v40, %v273_v31  ;;  %v282_v43 = vshll.u32 %v560_v42, %v273_v31 }
 0x126   :  { %v285_v45 = vshll.u32 %v561_v44, %v273_v31  ;;  %v288_v47 = vshll.u32 %v562_v46, %v273_v31  ;;  %vm291_vm3 = vcmp.lt.s32.totalorder %v272_v30, 1  ;;  %vm292_vm4 = vcmp.lt.s32.totalorder %v272_v30, 2 }
 0x127   :  { %v277_v48 = vshrl.u32 %v559_v40, %v274_v35  ;;  %v280_v49 = vshrl.u32 %v560_v42, %v274_v35  ;;  %v283_v50 = vshrl.u32 %v561_v44, %v274_v35  ;;  %v275_v51 = vshrl.u32 %v558_v36, %v274_v35 }
 0x128   :  { %v286_v52 = vshrl.u32 %v562_v46, %v274_v35  ;;  %v289_v54 = vshrl.u32 %v563_v53, %v274_v35  ;;  %v170_v58 = vsub.s32 32, %v169_v39  ;;  %vm293_vm5 = vcmp.lt.s32.totalorder %v272_v30, 3 }
 0x129   :  { %v278_v55 = vor.u32 %v277_v48, %v276_v37  ;;  %v281_v56 = vor.u32 %v280_v49, %v279_v41  ;;  %v284_v57 = vor.u32 %v283_v50, %v282_v43  ;;  %vm294_vm6 = vcmp.lt.s32.totalorder %v272_v30, 4 }
 0x12a   :  { %v287_v59 = vor.u32 %v286_v52, %v285_v45  ;;  %v290_v60 = vor.u32 %v289_v54, %v288_v47  ;;  %v172_v4 = vshll.u32 %v558_v36, %v169_v39  ;;  %v173_v7 = vshrl.u32 %v559_v40, %v170_v58 }
 0x12b   :  { %v295_v61 = vsel %vm291_vm3, %v275_v51, %v278_v55  ;;  %v296_v62 = vsel %vm294_vm6, %v284_v57, 2102212464  ;;  %v299_v63 = vsel %vm291_vm3, %v278_v55, %v281_v56  ;;  %v303_v0 = vsel %vm291_vm3, %v281_v56, %v284_v57 }
 0x12c   :  { %v297_v1 = vsel %vm293_vm5, %v281_v56, %v296_v62  ;;  %v300_v2 = vsel %vm294_vm6, %v287_v59, 920167782  ;;  %v304_v3 = vsel %vm294_vm6, %v290_v60, 1326507024  ;;  %v175_v8 = vshll.u32 %v559_v40, %v169_v39 }
 0x12d   :  { %v301_v5 = vsel %vm293_vm5, %v284_v57, %v300_v2  ;;  %v305_v6 = vsel %vm293_vm5, %v287_v59, %v304_v3  ;;  %v298_v9 = vsel %vm292_vm4, %v295_v61, %v297_v1  ;;  %v176_v17 = vshrl.u32 %v560_v42, %v170_v58 }
 0x12e   :  { %v302_v10 = vsel %vm292_vm4, %v299_v63, %v301_v5  ;;  %v306_v12 = vsel %vm292_vm4, %v303_v0, %v305_v6  ;;  %v174_v23 = vor.u32 %v173_v7, %v172_v4  ;;  %v178_v25 = vshll.u32 %v560_v42, %v169_v39 }
 0x12f   :  { %v668_v18 = vmul.u32.u64.low %v656_v33, %v306_v12  ;;  %v669_v19 = vmul.u32.u64.high %v656_v33, %v306_v12, %v668_v18  ;;  %v672_v20 = vmul.u32.u64.low %v656_v33, %v302_v10  ;;  %v673_v22 = vmul.u32.u64.high %v656_v33, %v302_v10, %v672_v20 }
 0x130   :  { %v177_v24 = vor.u32 %v176_v17, %v175_v8  ;;  %v179_v26 = vshrl.u32 %v561_v44, %v170_v58  ;;  %v181_v27 = vshll.u32 %v561_v44, %v169_v39  ;;  %v182_v28 = vshrl.u32 %v562_v46, %v170_v58 }
 0x131   :  { %v185_v29 = vshrl.u32 %v563_v53, %v170_v58  ;;  %v203_v31 = vshll.u32 %v163_v34, 8  ;;  %v314_v30 = vmul.u32 %v656_v33, %v298_v9  ;;  %v171_v32 = vshrl.u32 %v558_v36, %v170_v58 }
 0x132   :  { %v180_v35 = vor.u32 %v179_v26, %v178_v25  ;;  %v184_v37 = vshll.u32 %v562_v46, %v169_v39  ;;  %vm316_vm7 = vc.u32 %v669_v19, %v672_v20  ;;  %v317_v40 = vadd.s32 1, %v673_v22 }
 0x133   :  { %v183_v41 = vor.u32 %v182_v28, %v181_v27  ;;  %vm187_vm8 = vcmp.lt.s32.totalorder %v659_v38, 1  ;;  %vm189_vm9 = vcmp.lt.s32.totalorder %v659_v38, 3  ;;  %vm190_vm10 = vcmp.lt.s32.totalorder %v659_v38, 4 }
 0x134   :  { %v186_v43 = vor.u32 %v185_v29, %v184_v37  ;;  %v195_v42 = vsel %vm187_vm8, %v174_v23, %v177_v24  ;;  %v318_v34 = vsel %vm316_vm7, %v317_v40, %v673_v22  ;;  %v192_v44 = vsel %vm190_vm10, %v180_v35, 2102212464 }
 0x135   :  { %v196_v33 = vsel %vm190_vm10, %v183_v41, 920167782  ;;  %v199_v36 = vsel %vm187_vm8, %v177_v24, %v180_v35  ;;  %v319_v45 = vadd.s32 %v318_v34, %v314_v30  ;;  %vm188_vm11 = vcmp.lt.s32.totalorder %v659_v38, 2 }
 0x136   :  { %v197_v39 = vsel %vm189_vm9, %v180_v35, %v196_v33  ;;  %v200_v46 = vsel %vm190_vm10, %v186_v43, 1326507024  ;;  %v191_v47 = vsel %vm187_vm8, %v171_v32, %v174_v23  ;;  %v193_v48 = vsel %vm189_vm9, %v177_v24, %v192_v44 }
 0x137   :  { %v198_v49 = vsel %vm188_vm11, %v195_v42, %v197_v39  ;;  %v201_v50 = vsel %vm189_vm9, %v183_v41, %v200_v46  ;;  %v320_v51 = vadd.s32 536870912, %v319_v45  ;;  %v194_v58 = vsel %vm188_vm11, %v191_v47, %v193_v48 }
 0x138   :  { %v202_v52 = vsel %vm188_vm11, %v199_v36, %v201_v50  ;;  %v683_v53 = vmul.u32.u64.low %v203_v31, %v198_v49  ;;  %v684_v54 = vmul.u32.u64.high %v203_v31, %v198_v49, %v683_v53  ;;  %v210_v38 = vmul.u32 %v203_v31, %v194_v58 }
 0x139   :  { %v686_v55 = vmul.u32.u64.low %v203_v31, %v202_v52  ;;  %v687_v56 = vmul.u32.u64.high %v203_v31, %v202_v52, %v686_v55  ;;  %v321_v57 = vshrl.u32 %v320_v51, 30  ;;  %v315_v10 = vadd.s32 %v672_v20, %v669_v19 }
 0x13a   :  { %v213_v60 = vadd.s32 1, %v684_v54  ;;  %vm156_vm3 = vcmp.le.f32.partialorder %v155_v21, 0.7853982  ;;  %vm351_vm7 = vweird.f32 %v641_v14  ;;  %vm247_vm11 = vweird.f32 %v644_v15 }
 0x13b   :  { %v322_v59 = vshll.u32 %v321_v57, 30  ;;  %vm212_vm12 = vc.u32 %v687_v56, %v683_v53  ;;  %v211_v35 = vadd.s32 %v683_v53, %v687_v56  ;;  %v345_v20 = vsub.s32 4, %v321_v57 }
 0x13c   :  { %v214_v62 = vsel %vm212_vm12, %v213_v60, %v684_v54 }
 0x13d   :  { %v323_v61 = vsub.s32 %v319_v45, %v322_v59  ;;  %v215_v63 = vadd.s32 %v214_v62, %v210_v38  ;;  %v346_v45 = vsel %vm261_vm15, %v345_v20, %v321_v57 }
 0x13e   :  { %v348_v47 = vsel %vm260_vm1, 0, %v346_v45 }
 0x13f   :  { %v325_v0 = vsub.s32 0, %v323_v61  ;;  %v216_v1 = vadd.s32 536870912, %v215_v63  ;;  %v352_v52 = vadd.s32 3, %v348_v47 }
 0x141   :  { %v402_v2 = vmin.u32 %v325_v0, %v323_v61  ;;  %v217_v3 = vshrl.u32 %v216_v1, 30  ;;  %v353_v55 = vand.u32 3, %v352_v52  ;;  %v405_v0 = vld [vmem:[#allocation7 + $0x2] ss:$0 sm:$0xff] }
 0x143   :  { %v327_v4 = vclz %v402_v2  ;;  %v218_v5 = vshll.u32 %v217_v3, 30  ;;  %v241_v51 = vsub.s32 4, %v217_v3  ;;  %vm358_vm4 = vcmp.eq.s32.totalorder %v353_v55, 2 }
 0x144   :  { %vm355_vm5 = vcmp.eq.s32.totalorder %v353_v55, 0  ;;  %vm354_vm6 = vcmp.lt.s32.totalorder %v353_v55, 2 }
 0x145   :  { %v403_v6 = vadd.s32 4294967294, %v327_v4  ;;  %v219_v7 = vsub.s32 %v215_v63, %v218_v5  ;;  %v242_v54 = vsel %vm157_vm2, %v241_v51, %v217_v3 }
 0x146   :  { %v244_v58 = vsel %vm156_vm3, 0, %v242_v54 }
 0x147   :  { %vm404_vm13 = vcmp.lt.s32.totalorder %v403_v6, 0  ;;  %v221_v9 = vsub.s32 0, %v219_v7  ;;  %v248_v62 = vadd.s32 3, %v244_v58 }
 0x148   :  { %v330_v8 = vsel %vm404_vm13, 0, %v403_v6 }
 0x149   :  { %v331_v12 = vsub.s32 32, %v330_v8  ;;  %v335_v17 = vsub.s32 4294967266, %v330_v8  ;;  %v398_v18 = vmin.u32 %v221_v9, %v219_v7  ;;  %v332_v22 = vshll.u32 %v323_v61, %v330_v8 }
 0x14a   :  { %v249_v3 = vand.u32 3, %v248_v62 }
 0x14b   :  { %v333_v23 = vshrl.u32 %v315_v10, %v331_v12  ;;  %v336_v24 = vadd.s32 127, %v335_v17  ;;  %v223_v25 = vclz %v398_v18 }
 0x14c   :  { %vm254_vm8 = vcmp.eq.s32.totalorder %v249_v3, 2  ;;  %vm251_vm9 = vcmp.eq.s32.totalorder %v249_v3, 0  ;;  %vm250_vm10 = vcmp.lt.s32.totalorder %v249_v3, 2 }
 0x14d   :  { %v334_v26 = vor.u32 %v333_v23, %v332_v22  ;;  %v337_v27 = vshll.u32 %v336_v24, 23  ;;  %v399_v28 = vadd.s32 4294967294, %v223_v25 }
 0x14f   :  { %v338_v29 = vor.u32 4788187, %v337_v27  ;;  %vm400_vm14 = vcmp.lt.s32.totalorder %v399_v28, 0  ;;  %v341_v30 = vcvt.s32.f32 %v334_v26 }
 0x150   :  { %v226_v32 = vsel %vm400_vm14, 0, %v399_v28 }
 0x151   :  { %v339_v31 = vand.u32 2147483647, %v338_v29  ;;  %v227_v37 = vsub.s32 32, %v226_v32  ;;  %v231_v40 = vsub.s32 4294967266, %v226_v32  ;;  %v228_v41 = vshll.u32 %v219_v7, %v226_v32 }
 0x153   :  { %v342_v19 = vmul.f32 %v341_v30, %v339_v31  ;;  %v229_v43 = vshrl.u32 %v211_v35, %v227_v37  ;;  %v232_v42 = vadd.s32 127, %v231_v40 }
 0x155   :  { %v343_v34 = vxor.u32 2147483648, %v342_v19  ;;  %v230_v44 = vor.u32 %v229_v43, %v228_v41  ;;  %v233_v33 = vshll.u32 %v232_v42, 23 }
 0x157   :  { %v344_v36 = vsel %vm261_vm15, %v343_v34, %v342_v19  ;;  %v234_v46 = vor.u32 4788187, %v233_v33  ;;  %v237_v49 = vcvt.s32.f32 %v230_v44 }
 0x158   :  { %v347_v39 = vsel %vm260_vm1, %v641_v14, %v344_v36 }
 0x159   :  { %451 = vcosq.f32 %v347_v39  ;;  %v235_v48 = vand.u32 2147483647, %v234_v46 }
 0x15a   :  { %453 = vsinq.f32 %v347_v39 }
 0x15b   :  { %v238_v50 = vmul.f32 %v237_v49, %v235_v48 }
 0x15d   :  { %v239_v53 = vxor.u32 2147483648, %v238_v50 }
 0x15f   :  { %v240_v16 = vsel %vm157_vm2, %v239_v53, %v238_v50 }
 0x160   :  { %v243_v56 = vsel %vm156_vm3, %v644_v15, %v240_v16 }
 0x161   :  { %455 = vcosq.f32 %v243_v56 }
 0x162   :  { %457 = vsinq.f32 %v243_v56 }
 0x163   :  { %v452_v57 = vpop.eup %451 }
 0x164   :  { %v454_v59 = vpop.eup %453  ;;  %v359_v60 = vxor.u32 2147483648, %v452_v57 }
 0x165   :  { %v356_v38 = vxor.u32 2147483648, %v454_v59 }
 0x166   :  { %v360_v61 = vsel %vm358_vm4, %v359_v60, %v454_v59 }
 0x167   :  { %v357_v63 = vsel %vm355_vm5, %v452_v57, %v356_v38 }
 0x168   :  { %v361_v21 = vsel %vm354_vm6, %v357_v63, %v360_v61 }
 0x169   :  { %v362_v1 = vsel %vm351_vm7, nan, %v361_v21 }
 0x16a   :  { %v364_v2 = vmul.f32 %v362_v1, %v362_v1 }
 0x16b   :  { %v456_v4 = vpop.eup %455 }
 0x16c   :  { %v370_v5 = vmul.f32 %v405_v0, %v364_v2  ;;  %v458_v6 = vpop.eup %457  ;;  %v255_v7 = vxor.u32 2147483648, %v456_v4 }
 0x16d   :  { %v252_v9 = vxor.u32 2147483648, %v458_v6 }
 0x16e   :  { %v372_v8 = vadd.f32 %v370_v5, %v636_v11  ;;  %v256_v10 = vsel %vm254_vm8, %v255_v7, %v458_v6 }
 0x16f   :  { %v253_v12 = vsel %vm251_vm9, %v456_v4, %v252_v9 }
 0x170   :  { %374 = vst.msk [vmem:[#allocation8 + $0x8] sm:$0xff] %vm67_vm0, %v372_v8  ;;  %v257_v14 = vsel %vm250_vm10, %v253_v12, %v256_v10 }
 0x171   :  { %v258_v17 = vsel %vm247_vm11, nan, %v257_v14 }
 0x172   :  { %v363_v18 = vmul.f32 %v258_v17, %v258_v17 }
 0x174   :  { %v369_v22 = vmul.f32 %v405_v0, %v363_v18 }
 0x176   :  { %v371_v23 = vadd.f32 %v369_v22, %v638_v13 }
 0x178   :  { %373 = vst.msk [vmem:[#allocation8] sm:$0xff] %vm67_vm0, %v371_v23 }
 0x179   :  { %536 = shalt.err (!%p533_p0)
}
 0x17a   :  { %s537_s27 = scalar_lea.hbm %s726_s3, 256 }
 0x17b   :  { %p538_p1 = scmp.ne.s32.totalorder %s726_s3, %s537_s27  ;;  %p541_p2 = scmp.lt.u32.totalorder %s537_s27, %s726_s3 }
 0x17d   :  { %p543_p3 = pnand %p541_p2, %p538_p1 }
 0x17f   :  { %546 = shalt.err (!%p543_p3)
}
 0x180   :  { %386 = dma.vmem_to_hbm [thread:$0]  %s381_s21, 256, %s726_s3, [#allocation4], %s555_s24, %s555_s24, %s556_s25  }
 0x181   :  { %551 = dma.done.wait [#allocation4], 256  }
 0x182   :  { %552 = vsyncadd [#allocation4], 4294967040 }
 0x183   :  { %390 = vsyncpa [#allocation3], 1 }
 0x184   :  { %391 = vsyncpa [#allocation6], 1 }
 0x185   :  { %392 = vsyncpa [#allocation4], 1 }

</bundles_post_ra>
